<compile_context>
chip_gen: v6e
topology: v6e:2x2x1
jax: 0.10.0
libtpu: 0.0.40
codegen_flags: <defaults>
</compile_context>

<pallas_src>
import functools

import jax
import jax.numpy as jnp
from jax.experimental import pallas as pl
from jax.experimental.pallas import tpu as pltpu

N_FEATURES = 200
HIDDEN_PAD = 128            # 64-wide hidden zero-padded to 128 lanes (exact)
EPS = 1e-5

LAYER_DIMS = [(200, 128), (128, 64), (64, 128), (128, 200)]
NUM_LAYERS = len(LAYER_DIMS)
DEFAULT_TB = 1024           # batch tile; ~3 MiB double-buffered f32 I/O at 200 wide


def _round_up(n, m):
    return (n + m - 1) // m * m


def autoencoder_kernel(x_ref, w0, b0, w1, b1, w2, b2, w3, b3, o_ref):
    """4x fused (MXU matmul -> +bias -> ReLU) on one batch tile.

    BN is pre-folded into W/b, Dropout is identity (eval mode).  Weights are
    bf16 (MXU inputs); bias add / ReLU happen on the f32 accumulator so the
    VPU path is f32 on all chip generations (v5e has no bf16 VPU); the
    inter-layer activation is carried in bf16 to halve VMEM staging traffic.
    """
    h = x_ref[...].astype(jnp.bfloat16)
    layers = ((w0, b0), (w1, b1), (w2, b2), (w3, b3))
    for li, (w_ref, b_ref) in enumerate(layers):
        z = jnp.dot(h, w_ref[...], preferred_element_type=jnp.float32) + b_ref[...]
        a = jnp.maximum(z, 0.0)
        h = a if li == NUM_LAYERS - 1 else a.astype(jnp.bfloat16)
    o_ref[...] = h.astype(o_ref.dtype)


def _fold_params(params):
    """Fold eval-mode BatchNorm into each Linear; zero-pad the 64-wide hidden
    layer to 128 (exact); cast weights to bf16, biases stay f32 row vectors."""
    folded = []
    for li, (gamma, beta, mean, var, w, bias) in enumerate(params):
        scale = gamma * jax.lax.rsqrt(var + EPS)          # [din]
        w_f = scale[:, None] * w                          # [din, dout]
        b_f = (beta - mean * scale) @ w + bias            # [dout]
        if li == 1:   # encoder layer 2: output cols 64 -> 128 (zeros => ReLU=0)
            w_f = jnp.pad(w_f, ((0, 0), (0, HIDDEN_PAD - w_f.shape[1])))
            b_f = jnp.pad(b_f, (0, HIDDEN_PAD - b_f.shape[0]))
        if li == 2:   # decoder layer 1: input rows 64 -> 128 (zero rows)
            w_f = jnp.pad(w_f, ((0, HIDDEN_PAD - w_f.shape[0]), (0, 0)))
        folded.append((w_f.astype(jnp.bfloat16),
                       b_f.reshape(1, -1).astype(jnp.float32)))
    return folded


def inner_autoencoder_forward(x, params, *, tb=DEFAULT_TB):
    """x: [B, 200]. params: list of 4 tuples
    (gamma, beta, running_mean, running_var, W[in,out], bias[out])."""
    B = x.shape[0]
    folded = _fold_params(params)

    # Batch tile: multiple of 8, capped at ceil(B/2) so the grid has >= 2
    # steps whenever possible (both v7x TensorCores participate); keeps batch
    # padding minimal.  At tb=1024 the double-buffered f32 in/out tiles are
    # ~3 MiB total, well under v5e's 16 MiB default scoped-VMEM limit.
    b_ceil = _round_up(B, 8)
    half = _round_up((b_ceil + 1) // 2, 8)
    tb = max(8, min(tb, half))
    b_pad = _round_up(B, tb)
    x_p = x if b_pad == B else jnp.pad(x, ((0, b_pad - B), (0, 0)))

    inputs = [x_p]
    # Input/output blocks are 200 wide (== full array dim, no HBM pad pass).
    in_specs = [pl.BlockSpec((tb, N_FEATURES), lambda i: (i, 0))]
    for w_f, b_f in folded:
        inputs += [w_f, b_f]
        # Constant index maps -> weights/biases stay VMEM-resident across tiles.
        in_specs += [pl.BlockSpec(w_f.shape, lambda i: (0, 0)),
                     pl.BlockSpec(b_f.shape, lambda i: (0, 0))]

    out_shape = jax.ShapeDtypeStruct((b_pad, N_FEATURES), x.dtype)
    out_spec = pl.BlockSpec((tb, N_FEATURES), lambda i: (i, 0))

    flops = 2 * b_pad * (N_FEATURES * 128 + 128 * HIDDEN_PAD
                         + HIDDEN_PAD * 128 + 128 * N_FEATURES)
    bytes_accessed = (sum(int(a.size) * a.dtype.itemsize for a in inputs)
                      + b_pad * N_FEATURES * x.dtype.itemsize)

    out = pl.pallas_call(
        autoencoder_kernel,
        out_shape=out_shape,
        grid_spec=pltpu.PrefetchScalarGridSpec(
            num_scalar_prefetch=0,
            grid=(b_pad // tb,),
            in_specs=in_specs,
            out_specs=out_spec,
        ),
        compiler_params=pltpu.CompilerParams(
            dimension_semantics=("parallel",)),   # shards tiles across v7x's 2 TCs
        cost_estimate=pl.CostEstimate(
            flops=flops, transcendentals=0, bytes_accessed=bytes_accessed),
    )(*inputs)

    # Only the (rare) batch-pad rows need slicing off; feature dim is exact.
    return out if b_pad == B else out[:B]


def reference_forward(x, params):
    """Pure-JAX f32 eval-mode reference (unfolded BN) for correctness check."""
    h = x.astype(jnp.float32)
    for gamma, beta, mean, var, w, bias in params:
        h = (h - mean) * (gamma * jax.lax.rsqrt(var + EPS)) + beta
        h = jnp.maximum(h @ w + bias, 0.0)
    return h


def init_params(key):
    """Deterministic synthetic parameters matching the module's shapes."""
    params = []
    for i, (din, dout) in enumerate(LAYER_DIMS):
        k = jax.random.fold_in(key, i)
        kw, kb, kg, kbe, km, kv = jax.random.split(k, 6)
        bound = 1.0 / jnp.sqrt(din)
        w = jax.random.uniform(kw, (din, dout), jnp.float32, -bound, bound)
        bias = jax.random.uniform(kb, (dout,), jnp.float32, -bound, bound)
        gamma = 1.0 + 0.1 * jax.random.normal(kg, (din,), jnp.float32)
        beta = 0.1 * jax.random.normal(kbe, (din,), jnp.float32)
        mean = 0.05 * jax.random.normal(km, (din,), jnp.float32)
        var = 1.0 + 0.1 * jax.random.uniform(kv, (din,), jnp.float32)
        params.append((gamma, beta, mean, var, w, bias))
    return params


if __name__ == "__main__":
    key = jax.random.PRNGKey(0)
    kx, kp = jax.random.split(key)

    batch = 64
    x = jax.random.normal(kx, (batch, N_FEATURES), jnp.float32)
    params = init_params(kp)

    # Default tb gets capped to ceil(batch/2)=32 -> grid=(2,), exercising the
    # batch-tiled pipeline and the two-TensorCore split on v7x.
    fwd = jax.jit(functools.partial(inner_autoencoder_forward))
    out = fwd(x, params)
    jax.block_until_ready(out)

    assert out.shape == (batch, N_FEATURES), out.shape
    assert out.dtype == jnp.float32, out.dtype

    ref = reference_forward(x, params)
    max_err = float(jnp.max(jnp.abs(out - ref)))
    # bf16 weights/activations on the MXU -> loose tolerance vs f32 reference.
    assert bool(jnp.allclose(out, ref, atol=5e-2, rtol=5e-2)), max_err

    print("KERNEL_OK")
</pallas_src>

<mosaic_0001>
module attributes {stable_mosaic.version = 11 : i64} {
  func.func @autoencoder_kernel(%arg0: i32, %arg1: memref<32x200xf32, #tpu.memory_space<vmem>>, %arg2: memref<200x128xbf16, #tpu.memory_space<vmem>>, %arg3: memref<1x128xf32, #tpu.memory_space<vmem>>, %arg4: memref<128x128xbf16, #tpu.memory_space<vmem>>, %arg5: memref<1x128xf32, #tpu.memory_space<vmem>>, %arg6: memref<128x128xbf16, #tpu.memory_space<vmem>>, %arg7: memref<1x128xf32, #tpu.memory_space<vmem>>, %arg8: memref<128x200xbf16, #tpu.memory_space<vmem>>, %arg9: memref<1x200xf32, #tpu.memory_space<vmem>>, %arg10: memref<32x200xf32, #tpu.memory_space<vmem>>) attributes {dimension_semantics = [#tpu.dimension_semantics<parallel>], iteration_bounds = array<i64: 2>, scalar_prefetch = 0 : i64, scratch_operands = 0 : i64, tpu.core_type = #tpu.core_type<tc>, window_params = [{transform_indices = @transform_0, window_bounds = array<i64: 32, 200>}, {pipeline_mode = #tpu.pipeline_mode<synchronous>, transform_indices = @transform_1, window_bounds = array<i64: 200, 128>}, {pipeline_mode = #tpu.pipeline_mode<synchronous>, transform_indices = @transform_2, window_bounds = array<i64: 1, 128>}, {pipeline_mode = #tpu.pipeline_mode<synchronous>, transform_indices = @transform_3, window_bounds = array<i64: 128, 128>}, {pipeline_mode = #tpu.pipeline_mode<synchronous>, transform_indices = @transform_4, window_bounds = array<i64: 1, 128>}, {pipeline_mode = #tpu.pipeline_mode<synchronous>, transform_indices = @transform_5, window_bounds = array<i64: 128, 128>}, {pipeline_mode = #tpu.pipeline_mode<synchronous>, transform_indices = @transform_6, window_bounds = array<i64: 1, 128>}, {pipeline_mode = #tpu.pipeline_mode<synchronous>, transform_indices = @transform_7, window_bounds = array<i64: 128, 200>}, {pipeline_mode = #tpu.pipeline_mode<synchronous>, transform_indices = @transform_8, window_bounds = array<i64: 1, 200>}, {transform_indices = @transform_9, window_bounds = array<i64: 32, 200>}]} {
    %c0 = arith.constant 0 : index
    %c0_0 = arith.constant 0 : index
    %0 = vector.load %arg1[%c0, %c0_0] : memref<32x200xf32, #tpu.memory_space<vmem>>, vector<32x200xf32>
    %1 = arith.truncf %0 : vector<32x200xf32> to vector<32x200xbf16>
    %c0_1 = arith.constant 0 : index
    %c0_2 = arith.constant 0 : index
    %2 = vector.load %arg2[%c0_1, %c0_2] : memref<200x128xbf16, #tpu.memory_space<vmem>>, vector<200x128xbf16>
    %cst = arith.constant dense<0.000000e+00> : vector<32x128xf32>
    %3 = tpu.matmul %1, %2, %cst {dimension_numbers = #tpu.dot_dimension_numbers<[1], [0], [0], [1], [0, 0, 1, 1], [], []>} : vector<32x200xbf16>, vector<200x128xbf16>, vector<32x128xf32> -> vector<32x128xf32>
    %c0_3 = arith.constant 0 : index
    %c0_4 = arith.constant 0 : index
    %4 = vector.load %arg3[%c0_3, %c0_4] : memref<1x128xf32, #tpu.memory_space<vmem>>, vector<1x128xf32>
    %5 = vector.broadcast %4 : vector<1x128xf32> to vector<32x128xf32>
    %6 = arith.addf %3, %5 : vector<32x128xf32>
    %cst_5 = arith.constant 0.000000e+00 : f32
    %7 = vector.broadcast %cst_5 : f32 to vector<32x128xf32>
    %8 = arith.maximumf %6, %7 : vector<32x128xf32>
    %9 = arith.truncf %8 : vector<32x128xf32> to vector<32x128xbf16>
    %c0_6 = arith.constant 0 : index
    %c0_7 = arith.constant 0 : index
    %10 = vector.load %arg4[%c0_6, %c0_7] : memref<128x128xbf16, #tpu.memory_space<vmem>>, vector<128x128xbf16>
    %cst_8 = arith.constant dense<0.000000e+00> : vector<32x128xf32>
    %11 = tpu.matmul %9, %10, %cst_8 {dimension_numbers = #tpu.dot_dimension_numbers<[1], [0], [0], [1], [0, 0, 1, 1], [], []>} : vector<32x128xbf16>, vector<128x128xbf16>, vector<32x128xf32> -> vector<32x128xf32>
    %c0_9 = arith.constant 0 : index
    %c0_10 = arith.constant 0 : index
    %12 = vector.load %arg5[%c0_9, %c0_10] : memref<1x128xf32, #tpu.memory_space<vmem>>, vector<1x128xf32>
    %13 = vector.broadcast %12 : vector<1x128xf32> to vector<32x128xf32>
    %14 = arith.addf %11, %13 : vector<32x128xf32>
    %cst_11 = arith.constant 0.000000e+00 : f32
    %15 = vector.broadcast %cst_11 : f32 to vector<32x128xf32>
    %16 = arith.maximumf %14, %15 : vector<32x128xf32>
    %17 = arith.truncf %16 : vector<32x128xf32> to vector<32x128xbf16>
    %c0_12 = arith.constant 0 : index
    %c0_13 = arith.constant 0 : index
    %18 = vector.load %arg6[%c0_12, %c0_13] : memref<128x128xbf16, #tpu.memory_space<vmem>>, vector<128x128xbf16>
    %cst_14 = arith.constant dense<0.000000e+00> : vector<32x128xf32>
    %19 = tpu.matmul %17, %18, %cst_14 {dimension_numbers = #tpu.dot_dimension_numbers<[1], [0], [0], [1], [0, 0, 1, 1], [], []>} : vector<32x128xbf16>, vector<128x128xbf16>, vector<32x128xf32> -> vector<32x128xf32>
    %c0_15 = arith.constant 0 : index
    %c0_16 = arith.constant 0 : index
    %20 = vector.load %arg7[%c0_15, %c0_16] : memref<1x128xf32, #tpu.memory_space<vmem>>, vector<1x128xf32>
    %21 = vector.broadcast %20 : vector<1x128xf32> to vector<32x128xf32>
    %22 = arith.addf %19, %21 : vector<32x128xf32>
    %cst_17 = arith.constant 0.000000e+00 : f32
    %23 = vector.broadcast %cst_17 : f32 to vector<32x128xf32>
    %24 = arith.maximumf %22, %23 : vector<32x128xf32>
    %25 = arith.truncf %24 : vector<32x128xf32> to vector<32x128xbf16>
    %c0_18 = arith.constant 0 : index
    %c0_19 = arith.constant 0 : index
    %26 = vector.load %arg8[%c0_18, %c0_19] : memref<128x200xbf16, #tpu.memory_space<vmem>>, vector<128x200xbf16>
    %cst_20 = arith.constant dense<0.000000e+00> : vector<32x200xf32>
    %27 = tpu.matmul %25, %26, %cst_20 {dimension_numbers = #tpu.dot_dimension_numbers<[1], [0], [0], [1], [0, 0, 1, 1], [], []>} : vector<32x128xbf16>, vector<128x200xbf16>, vector<32x200xf32> -> vector<32x200xf32>
    %c0_21 = arith.constant 0 : index
    %c0_22 = arith.constant 0 : index
    %28 = vector.load %arg9[%c0_21, %c0_22] : memref<1x200xf32, #tpu.memory_space<vmem>>, vector<1x200xf32>
    %29 = vector.broadcast %28 : vector<1x200xf32> to vector<32x200xf32>
    %30 = arith.addf %27, %29 : vector<32x200xf32>
    %cst_23 = arith.constant 0.000000e+00 : f32
    %31 = vector.broadcast %cst_23 : f32 to vector<32x200xf32>
    %32 = arith.maximumf %30, %31 : vector<32x200xf32>
    %c0_24 = arith.constant 0 : index
    %c0_25 = arith.constant 0 : index
    %33 = vector.load %arg10[%c0_24, %c0_25] : memref<32x200xf32, #tpu.memory_space<vmem>>, vector<32x200xf32>
    tpu.vector_store %arg10[%c0_24, %c0_25], %32 {strides = array<i32>} : memref<32x200xf32, #tpu.memory_space<vmem>>, vector<32x200xf32>,
    return
  }
  func.func @transform_0(%arg0: i32) -> (i32, i32) {
    %c0_i32 = arith.constant 0 : i32
    %c0_i32_0 = arith.constant 0 : i32
    return %arg0, %c0_i32 : i32, i32
  }
  func.func @transform_1(%arg0: i32) -> (i32, i32) {
    %c0_i32 = arith.constant 0 : i32
    %c0_i32_0 = arith.constant 0 : i32
    %c0_i32_1 = arith.constant 0 : i32
    return %c0_i32, %c0_i32_0 : i32, i32
  }
  func.func @transform_2(%arg0: i32) -> (i32, i32) {
    %c0_i32 = arith.constant 0 : i32
    %c0_i32_0 = arith.constant 0 : i32
    %c0_i32_1 = arith.constant 0 : i32
    return %c0_i32, %c0_i32_0 : i32, i32
  }
  func.func @transform_3(%arg0: i32) -> (i32, i32) {
    %c0_i32 = arith.constant 0 : i32
    %c0_i32_0 = arith.constant 0 : i32
    %c0_i32_1 = arith.constant 0 : i32
    return %c0_i32, %c0_i32_0 : i32, i32
  }
  func.func @transform_4(%arg0: i32) -> (i32, i32) {
    %c0_i32 = arith.constant 0 : i32
    %c0_i32_0 = arith.constant 0 : i32
    %c0_i32_1 = arith.constant 0 : i32
    return %c0_i32, %c0_i32_0 : i32, i32
  }
  func.func @transform_5(%arg0: i32) -> (i32, i32) {
    %c0_i32 = arith.constant 0 : i32
    %c0_i32_0 = arith.constant 0 : i32
    %c0_i32_1 = arith.constant 0 : i32
    return %c0_i32, %c0_i32_0 : i32, i32
  }
  func.func @transform_6(%arg0: i32) -> (i32, i32) {
    %c0_i32 = arith.constant 0 : i32
    %c0_i32_0 = arith.constant 0 : i32
    %c0_i32_1 = arith.constant 0 : i32
    return %c0_i32, %c0_i32_0 : i32, i32
  }
  func.func @transform_7(%arg0: i32) -> (i32, i32) {
    %c0_i32 = arith.constant 0 : i32
    %c0_i32_0 = arith.constant 0 : i32
    %c0_i32_1 = arith.constant 0 : i32
    return %c0_i32, %c0_i32_0 : i32, i32
  }
  func.func @transform_8(%arg0: i32) -> (i32, i32) {
    %c0_i32 = arith.constant 0 : i32
    %c0_i32_0 = arith.constant 0 : i32
    %c0_i32_1 = arith.constant 0 : i32
    return %c0_i32, %c0_i32_0 : i32, i32
  }
  func.func @transform_9(%arg0: i32) -> (i32, i32) {
    %c0_i32 = arith.constant 0 : i32
    %c0_i32_0 = arith.constant 0 : i32
    return %arg0, %c0_i32 : i32, i32
  }
}

</mosaic_0001>

<bundles_post_ra>
// kernel: inner_autoencoder_forward.1
= control target key start
LH: loop header
LB: loop body
LE: loop exit
PB: predicated region body
PF: predicated region fallthrough
CT: control target
= control target key end

     0   :  { %14 = vsyncpa [#allocation3], 0  ;;  %s1650_s0 = inlined_call_operand.vmem [shape: f32[64,200], index: 0, kind: input, shape index: {}]   ;;  %s1651_s1 = inlined_call_operand.vmem [shape: bf16[200,128], index: 1, kind: input, shape index: {}]   ;;  %s1652_s2 = inlined_call_operand.vmem [shape: f32[1,128], index: 2, kind: input, shape index: {}]   ;;  %s1653_s3 = inlined_call_operand.vmem [shape: bf16[128,128], index: 3, kind: input, shape index: {}]   ;;  %s1654_s4 = inlined_call_operand.vmem [shape: f32[1,128], index: 4, kind: input, shape index: {}]   ;;  %s1655_s5 = inlined_call_operand.vmem [shape: bf16[128,128], index: 5, kind: input, shape index: {}]   ;;  %s1656_s6 = inlined_call_operand.vmem [shape: f32[1,128], index: 6, kind: input, shape index: {}]   ;;  %s1657_s7 = inlined_call_operand.vmem [shape: bf16[128,200], index: 7, kind: input, shape index: {}]   ;;  %s1658_s8 = inlined_call_operand.vmem [shape: f32[1,200], index: 8, kind: input, shape index: {}]   ;;  %s1659_s9 = inlined_call_operand.hbm [shape: f32[64,200], index: 9, kind: output, shape index: {}]  }
   0x1   :  { %16 = vsyncpa [#allocation3 + $0x1], 0  ;;  %s1367_s30 = smov 0   ;;  %s1369_s10 = smov 0  }
   0x2   :  { %s1371_s11 = smov 0   ;;  %s1373_s12 = smov 0  }
   0x3 LB: > { %s1388_s13 = sadd.s32 4294967295, %s1311_s12   ;;  %s1029_s14 = sadd.s32 4294967294, %s1311_s12   ;;  %s1311_s12 = sphi %s1373_s12, %s1665_s12   ;;  %s1307_s11 = sphi %s1371_s11, %s1664_s11   ;;  %s1303_s10 = sphi %s1369_s10, %s1663_s10   ;;  %s1299_s30 = sphi %s1367_s30, %s1662_s30  }
   0x4   : > { %s1392_s15 = sadd.s32 1, %s1311_s12   ;;  %s223_s16 = sadd.s32 1, %s1307_s11 }
   0x5   : > { %s220_s17 = ssub.s32 %s1311_s12, %s1392_s15  ;;  %p233_p0 = scmp.ne.s32.totalorder %s1307_s11, %s1303_s10 }
   0x6   : > { %p221_p1 = scmp.eq.s32.totalorder %s220_s17, 0  ;;  %p234_p2 = scmp.eq.s32.totalorder %s1388_s13, 1 }
   0x7   : > { %p239_p3 = scmp.ne.s32.totalorder %s1303_s10, %s1299_s30  ;;  %p240_p4 = scmp.eq.s32.totalorder %s1029_s14, 1 }
   0x8   : > { %s1403_s18 = scalar_select %p221_p1, %s1307_s11, %s223_s16  }
   0x9   : > { %p1405_p5 = por %p234_p2, %p233_p0  ;;  %p1409_p6 = por %p240_p4, %p239_p3 }
   0xa   : > { %p1032_p7 = scmp.ge.s32.totalorder %s1311_s12, 1  ;;  %p292_p8 = scmp.lt.s32.totalorder %s1311_s12, 3 }
   0xc   : > { %p293_p9 = pnand %p1032_p7, %p292_p8 }
   0xd   : > { %s1034_s25 = sshll.u32 (!%p293_p9), %s1388_s13, 2  ;;  %s326_s14 = sand.u32 (!%p293_p9), 1, %s1303_s10  }
   0xe   : > { %296 = sbr.rel (%p293_p9) target bundleno = 919 (0x397), region = 56  ;;  %p330_p10 = scmp.lt.s32.totalorder (!%p293_p9), %s1034_s25, 7 }
   0xf   : > { %s1033_s17 = sshll.u32 (!%p293_p9), %s326_s14, 6  ;;  %s1095_s21 = sshll.u32 (!%p293_p9), %s1388_s13, 10 }
  0x10   : > { %s1610_s13 = scalar_lea.sflag (!%p293_p9), [#allocation3], %s326_s14  ;;  %s1314_s27 = smov (!%p293_p9), [#allocation2]  }
  0x13   : > { %v1198_v0 = vld [vmem:[%s1651_s1 + $0x38] sm:$0xff]   ;;  %v1313_v1 = vmov 0   ;;  %v1199_v2 = vld [vmem:[%s1651_s1 + $0x30] sm:$0xff]   ;;  %s1667_s25 = smov (!%p330_p10, %s1034_s25), 7  ;;  %v1200_v3 = vld [vmem:[%s1651_s1 + $0x28] sm:$0xff]   ;;  %vm457_vm0 = vcmask 588800  }
  0x14   : > { %468 = vmatprep.subr.bf16.mxu0 %v1313_v1  ;;  %s1093_s28 = sshll.u32 %s1667_s25, 4  ;;  %v1201_v4 = vld [vmem:[%s1651_s1 + $0x20] sm:$0xff]   ;;  %v1202_v7 = vld [vmem:[%s1651_s1 + $0x18] sm:$0xff]   ;;  %v1212_v10 = vld [vmem:[%s1653_s3 + $0x30] sm:$0xff]   ;;  %vm464_vm1 = vcmask 1043456   ;;  %s1603_s25 = scalar_lea.hbm %s1659_s9, %s1095_s21 }
  0x15   : > { %469 = vmatpush1.bf16.msra.mxu0 %v1198_v0  ;;  %s1431_s16 = scalar_lea.vmem %s1650_s0, %s1093_s28  ;;  %v1211_v9 = vld [vmem:[%s1653_s3 + $0x38] sm:$0xff]   ;;  %v1203_v11 = vld [vmem:[%s1651_s1 + $0x10] sm:$0xff]   ;;  %v1213_v12 = vld [vmem:[%s1653_s3 + $0x28] sm:$0xff]   ;;  %s1255_s28 = sshll.u32 %s1314_s27, 4  ;;  %s1256_s28 = int_to_ptr.vmem [resolvable:$false] %s1255_s28 }
  0x16   : > { %470 = vmatprep.subr.bf16.mxu0 %v1313_v1  ;;  %v339_v5 = vld [vmem:[%s1431_s16 + $0x8] sm:$0xff]  ;;  %v341_v6 = vld [vmem:[%s1431_s16 + $0x18] sm:$0xff]  ;;  %1116 = vmatprep.subr.bf16.mxu1 %v1211_v9  ;;  %v1214_v14 = vld [vmem:[%s1653_s3 + $0x20] sm:$0xff]   ;;  %s1257_s29 = scalar_lea.vmem %s1256_s28, 2048 }
  0x17   : > { %v347_v8 = vpack.c.bf16 %v341_v6, %v339_v5  ;;  %1117 = vmatpush3.bf16.msra.mxu1 %v1211_v9  ;;  %v1204_v13 = vld [vmem:[%s1651_s1 + $0x8] sm:$0xff]   ;;  %v1205_v15 = vld [vmem:[%s1651_s1] sm:$0xff]   ;;  %v1207_v18 = vld [vmem:[%s1651_s1 + $0x58] sm:$0xff]  }
  0x18   : > { %1118 = vmatprep.subr.bf16.mxu1 %v1212_v10  ;;  %v1206_v16 = vld [vmem:[%s1651_s1 + $0x60] ss:$0 sps:$4 sm:$0xff]   ;;  %v1208_v19 = vld [vmem:[%s1651_s1 + $0x50] sm:$0xff]   ;;  %v1209_v20 = vld [vmem:[%s1651_s1 + $0x48] sm:$0xff]  }
  0x19   : > { %471 = vmatpush1.bf16.msra.mxu0 %v1199_v2  ;;  %1051 = vmatprep.mubr.msk.bf16.mxu0 %vm457_vm0, %v347_v8  ;;  %v466_v17 = vsel %vm464_vm1, %v1206_v16, 0  ;;  %v1210_v21 = vld [vmem:[%s1651_s1 + $0x40] sm:$0xff]   ;;  %v340_v23 = vld [vmem:[%s1431_s16 + $0x10] sm:$0xff]  ;;  %v343_v24 = vld [vmem:[%s1431_s16 + $0x28] sm:$0xff] }
  0x1a   : > { %472 = vmatprep.subr.bf16.mxu0 %v1313_v1  ;;  %v338_v22 = vld [vmem:[%s1431_s16] sm:$0xff]  ;;  %v345_v25 = vld [vmem:[%s1431_s16 + $0x38] sm:$0xff]  ;;  %v344_v29 = vld [vmem:[%s1431_s16 + $0x30] sm:$0xff] }
  0x1b   : > { %1119 = vmatpush3.bf16.msra.mxu1 %v1212_v10  ;;  %v346_v26 = vpack.c.bf16 %v340_v23, %v338_v22  ;;  %v349_v27 = vpack.c.bf16 %v345_v25, %v343_v24  ;;  %v342_v28 = vld [vmem:[%s1431_s16 + $0x20] sm:$0xff]  ;;  %v1215_v31 = vld [vmem:[%s1653_s3 + $0x18] sm:$0xff]   ;;  %v1216_v32 = vld [vmem:[%s1653_s3 + $0x10] sm:$0xff]   ;;  %s328_s16 = scalar_lea.vmem [#allocation2], %s1033_s17 }
  0x1c   : > { %1120 = vmatprep.subr.bf16.mxu1 %v1213_v12  ;;  %v348_v30 = vpack.c.bf16 %v344_v29, %v342_v28  ;;  %v1217_v33 = vld [vmem:[%s1653_s3 + $0x8] sm:$0xff]   ;;  %v1218_v34 = vld [vmem:[%s1653_s3] sm:$0xff]   ;;  %v1219_v35 = vld [vmem:[%s1655_s5 + $0x38] sm:$0xff]   ;;  %s967_s22 = sshll.u32 %s328_s16, 4  ;;  %s1605_s22 = int_to_ptr.vmem [resolvable:$true] %s967_s22 }
  0x1d   : > { %473 = vmatpush1.bf16.msra.mxu0 %v1200_v3  ;;  %v1037_v36 = vld [vmem:[%s1652_s2] ss:$0 sm:$0xff]  ;;  %v1220_v55 = vld [vmem:[%s1655_s5 + $0x30] sm:$0xff]   ;;  %v1221_v56 = vld [vmem:[%s1655_s5 + $0x28] sm:$0xff]   ;;  %s1251_s26 = scalar_lea.vmem %s1605_s22, 1024  ;;  %p1258_p0 = scmp.lt.s32.totalorder %s1605_s22, %s1256_s28 }
  0x1e   : > { %474 = vmatprep.subr.bf16.mxu0 %v1313_v1  ;;  %v1222_v57 = vld [vmem:[%s1655_s5 + $0x20] sm:$0xff]   ;;  %v1223_v58 = vld [vmem:[%s1655_s5 + $0x18] sm:$0xff]   ;;  %v1224_v59 = vld [vmem:[%s1655_s5 + $0x10] sm:$0xff]   ;;  %p1252_p11 = scmp.ne.s32.totalorder %s1605_s22, %s1251_s26  ;;  %p1259_p1 = scmp.lt.s32.totalorder %s1257_s29, %s1251_s26 }
  0x1f   : > { %1121 = vmatpush3.bf16.msra.mxu1 %v1213_v12  ;;  %v1225_v60 = vld [vmem:[%s1655_s5 + $0x8] sm:$0xff]   ;;  %v1226_v61 = vld [vmem:[%s1655_s5] sm:$0xff]   ;;  %v1227_v62 = vld [vmem:[%s1657_s7 + $0x70] ss:$8 sps:$4 sm:$0xff]  }
  0x20   : > { %1122 = vmatprep.subr.bf16.mxu1 %v1214_v14  ;;  %v1229_v63 = vld [vmem:[%s1657_s7 + $0x74] ss:$8 sps:$4 sm:$0xff]   ;;  %v1232_v0 = vld [vmem:[%s1657_s7 + $0x64] ss:$8 sps:$4 sm:$0xff]   ;;  %v1230_v2 = vld [vmem:[%s1657_s7 + $0x60] ss:$8 sps:$4 sm:$0xff]   ;;  %p1253_p12 = pnand %p1252_p11, %p1405_p5  ;;  %p1260_p2 = por %p1259_p1, %p1258_p0 }
  0x21   : > { %475 = vmatpush1.bf16.msra.mxu0 %v1201_v4  ;;  %v1235_v3 = vld [vmem:[%s1657_s7 + $0x54] ss:$8 sps:$4 sm:$0xff]   ;;  %v1233_v4 = vld [vmem:[%s1657_s7 + $0x50] ss:$8 sps:$4 sm:$0xff]   ;;  %v1238_v5 = vld [vmem:[%s1657_s7 + $0x44] ss:$8 sps:$4 sm:$0xff]  }
  0x22   : > { %476 = vmatprep.subr.bf16.mxu0 %v1313_v1  ;;  %v1236_v6 = vld [vmem:[%s1657_s7 + $0x40] ss:$8 sps:$4 sm:$0xff]   ;;  %v1239_v8 = vld [vmem:[%s1657_s7 + $0x30] ss:$8 sps:$4 sm:$0xff]   ;;  %v1244_v24 = vld [vmem:[%s1657_s7 + $0x24] ss:$8 sps:$4 sm:$0xff]   ;;  %p1254_p13 = pneg %p1253_p12 }
  0x23   : > { %1123 = vmatpush3.bf16.msra.mxu1 %v1214_v14  ;;  %v1242_v25 = vld [vmem:[%s1657_s7 + $0x20] ss:$8 sps:$4 sm:$0xff]   ;;  %v1250_v28 = vld [vmem:[%s1657_s7 + $0x4] ss:$8 sps:$4 sm:$0xff]  }
  0x24   : > { %1124 = vmatprep.subr.bf16.mxu1 %v1215_v31  ;;  %v1248_v29 = vld [vmem:[%s1657_s7] ss:$8 sps:$4 sm:$0xff]   ;;  %p1261_p3 = pnand %p1260_p2, %p1254_p13 }
  0x25   : > { %477 = vmatpush1.bf16.msra.mxu0 %v1202_v7  ;;  %v1241_v7 = vld [vmem:[%s1657_s7 + $0x34] ss:$8 sps:$4 sm:$0xff]  }
  0x26   : > { %478 = vmatprep.subr.bf16.mxu0 %v1313_v1 }
  0x27   : > { %1125 = vmatpush3.bf16.msra.mxu1 %v1215_v31 }
  0x28   : > { %1126 = vmatprep.subr.bf16.mxu1 %v1216_v32 }
  0x29   : > { %479 = vmatpush1.bf16.msra.mxu0 %v1203_v11  ;;  %v1053_v11 = vld [vmem:[%s1654_s4] ss:$0 sm:$0xff] }
  0x2a   : > { %480 = vmatprep.subr.bf16.mxu0 %v1313_v1 }
  0x2b   : > { %1127 = vmatpush3.bf16.msra.mxu1 %v1216_v32  ;;  %v1062_v32 = vld [vmem:[%s1656_s6] ss:$0 sm:$0xff] }
  0x2c   : > { %1128 = vmatprep.subr.bf16.mxu1 %v1217_v33 }
  0x2d   : > { %481 = vmatpush1.bf16.msra.mxu0 %v1204_v13 }
  0x2e   : > { %482 = vmatprep.subr.bf16.mxu0 %v1313_v1 }
  0x2f   : > { %1129 = vmatpush3.bf16.msra.mxu1 %v1217_v33 }
  0x30   : > { %1130 = vmatprep.subr.bf16.mxu1 %v1218_v34 }
  0x31   : > { %483 = vmatpush1.bf16.msra.mxu0 %v1205_v15 }
  0x32   : > { %490 = vmatprep.subr.bf16.mxu0 %v1313_v1 }
  0x33   : > { %1131 = vmatpush3.bf16.msra.mxu1 %v1218_v34 }
  0x34   : > { %1136 = vmatprep.subr.bf16.mxu1 %v1219_v35 }
  0x35   : > { %491 = vmatpush2.bf16.msra.mxu0 %v466_v17 }
  0x36   : > { %492 = vmatprep.subr.bf16.mxu0 %v1313_v1 }
  0x39   : > { %493 = vmatpush2.bf16.msra.mxu0 %v1207_v18 }
  0x3a   : > { %494 = vmatprep.subr.bf16.mxu0 %v1313_v1 }
  0x3d   : > { %495 = vmatpush2.bf16.msra.mxu0 %v1208_v19 }
  0x3e   : > { %496 = vmatprep.subr.bf16.mxu0 %v1313_v1 }
  0x41   : > { %497 = vmatpush2.bf16.msra.mxu0 %v1209_v20 }
  0x42   : > { %498 = vmatprep.subr.bf16.mxu0 %v1313_v1 }
  0x45   : > { %499 = vmatpush2.bf16.msra.mxu0 %v1210_v21 }
  0x46   : > { %883 = vmatprep.subr.bf16.mxu0 %v1229_v63 }
  0x48   : > { %501 = vmatmul.mubr.bf16.vlgmr.msra.gmra.mxu0 %v346_v26  ;;  %v1247_v26 = vld [vmem:[%s1657_s7 + $0x14] ss:$8 sps:$4 sm:$0xff]  }
  0x49   : > { %1052 = vmatprep.mubr.msk.bf16.mxu0 %vm457_vm0, %v349_v27  ;;  %884 = vmatpush1.bf16.msra.mxu0 %v1227_v62  ;;  %v1245_v27 = vld [vmem:[%s1657_s7 + $0x10] ss:$8 sps:$4 sm:$0xff]  }
  0x4a   : > { %885 = vmatprep.subr.bf16.mxu0 %v1232_v0 }
  0x4d   : > { %886 = vmatpush1.bf16.msra.mxu0 %v1230_v2 }
  0x4e   : > { %887 = vmatprep.subr.bf16.mxu0 %v1235_v3 }
  0x50   : > { %509 = vmatmul.mubr.bf16.gmra.mxu0 %v348_v30 }
  0x51   : > { %915 = vmatprep.mubr.bf16.mxu0 %v1313_v1  ;;  %888 = vmatpush1.bf16.msra.mxu0 %v1233_v4 }
  0x52   : > { %889 = vmatprep.subr.bf16.mxu0 %v1238_v5 }
  0x55   : > { %890 = vmatpush1.bf16.msra.mxu0 %v1236_v6 }
  0x56   : > { %891 = vmatprep.subr.bf16.mxu0 %v1241_v7 }
  0x59   : > { %892 = vmatpush1.bf16.msra.mxu0 %v1239_v8 }
  0x5a   : > { %893 = vmatprep.subr.bf16.mxu0 %v1244_v24 }
  0x5d   : > { %894 = vmatpush1.bf16.msra.mxu0 %v1242_v25 }
  0x5e   : > { %895 = vmatprep.subr.bf16.mxu0 %v1247_v26 }
  0x61   : > { %896 = vmatpush1.bf16.msra.mxu0 %v1245_v27 }
  0x62   : > { %897 = vmatprep.subr.bf16.mxu0 %v1250_v28 }
  0x65   : > { %898 = vmatpush1.bf16.msra.mxu0 %v1248_v29 }
 0x108   : > { %v502_v37 = vpop.f32.mrf.mxu0 }
 0x109   : > { %v503_v39 = vadd.f32 %v1037_v36, %v502_v37 }
 0x10a   : > { %v504_v38 = vpop.f32.mrf.mxu0 }
 0x10b   : > { %v517_v43 = vmax.f32 %v503_v39, 0.0 }
 0x10c   : > { %v505_v40 = vpop.f32.mrf.mxu0 }
 0x10d   : > { %v506_v41 = vadd.f32 %v1037_v36, %v505_v40 }
 0x10e   : > { %v507_v42 = vpop.f32.mrf.mxu0 }
 0x10f   : > { %v518_v44 = vmax.f32 %v506_v41, 0.0 }
 0x110   : > { %v510_v45 = vpop.f32.mrf.mxu0 }
 0x111   : > { %v521_v46 = vpack.c.bf16 %v518_v44, %v517_v43  ;;  %v511_v48 = vadd.f32 %v1037_v36, %v510_v45  ;;  %v793_v45 = vlaneseq }
 0x112   : > { %v512_v47 = vpop.f32.mrf.mxu0 }
 0x113   : > { %1132 = vmatprep.mubr.bf16.mxu1 %v521_v46  ;;  %v519_v52 = vmax.f32 %v511_v48, 0.0  ;;  %v794_v46 = vshrl.u32 %v793_v45, 7  ;;  %v791_v48 = vld [vmem:[%s1658_s8] sm:$0x3] }
 0x114   : > { %v513_v49 = vpop.f32.mrf.mxu0 }
 0x115   : > { %v514_v50 = vadd.f32 %v1037_v36, %v513_v49  ;;  %v795_v47 = vsub.s32 0, %v794_v46  ;;  %v799_v49 = vsub.s32 1, %v794_v46 }
 0x116   : > { %v515_v51 = vpop.f32.mrf.mxu0 }
 0x117   : > { %v520_v53 = vmax.f32 %v514_v50, 0.0  ;;  %v796_v50 = vrot.slane %v791_v48, %v795_v47  ;;  %v800_v51 = vrot.slane %v791_v48, %v799_v49 }
 0x119   : > { %v522_v54 = vpack.c.bf16 %v520_v53, %v519_v52 }
 0x11b   : > { %1133 = vmatmul.mubr.bf16.vlgmr.msra.gmra.mxu1 %v522_v54 }
 0x11c   : > { %1137 = vmatpush3.bf16.msra.mxu1 %v1219_v35 }
 0x11d   : > { %1138 = vmatprep.subr.bf16.mxu1 %v1220_v55 }
 0x120   : > { %1139 = vmatpush3.bf16.msra.mxu1 %v1220_v55 }
 0x121   : > { %1140 = vmatprep.subr.bf16.mxu1 %v1221_v56 }
 0x124   : > { %1141 = vmatpush3.bf16.msra.mxu1 %v1221_v56 }
 0x125   : > { %1142 = vmatprep.subr.bf16.mxu1 %v1222_v57 }
 0x128   : > { %1143 = vmatpush3.bf16.msra.mxu1 %v1222_v57 }
 0x129   : > { %1144 = vmatprep.subr.bf16.mxu1 %v1223_v58 }
 0x12c   : > { %1145 = vmatpush3.bf16.msra.mxu1 %v1223_v58 }
 0x12d   : > { %1146 = vmatprep.subr.bf16.mxu1 %v1224_v59 }
 0x130   : > { %1147 = vmatpush3.bf16.msra.mxu1 %v1224_v59 }
 0x131   : > { %1148 = vmatprep.subr.bf16.mxu1 %v1225_v60 }
 0x134   : > { %1149 = vmatpush3.bf16.msra.mxu1 %v1225_v60 }
 0x135   : > { %1150 = vmatprep.subr.bf16.mxu1 %v1226_v61 }
 0x138   : > { %1151 = vmatpush3.bf16.msra.mxu1 %v1226_v61 }
 0x1db   : > { %v1134_v9 = vpop.f32.mrf.mxu1 }
 0x1dc   : > { %v637_v15 = vadd.f32 %v1134_v9, %v1053_v11 }
 0x1dd   : > { %v628_v10 = vpop.f32.mrf.mxu1 }
 0x1de   : > { %v629_v13 = vadd.f32 %v1053_v11, %v628_v10  ;;  %v645_v21 = vmax.f32 %v637_v15, 0.0 }
 0x1df   : > { %v1135_v12 = vpop.f32.mrf.mxu1 }
 0x1e0   : > { %v640_v14 = vadd.f32 %v1135_v12, %v1053_v11  ;;  %v643_v19 = vmax.f32 %v629_v13, 0.0 }
 0x1e1   : > { %v631_v16 = vpop.f32.mrf.mxu1 }
 0x1e2   : > { %v632_v17 = vadd.f32 %v1053_v11, %v631_v16  ;;  %v646_v18 = vmax.f32 %v640_v14, 0.0 }
 0x1e4   : > { %v644_v20 = vmax.f32 %v632_v17, 0.0  ;;  %v648_v23 = vpack.c.bf16 %v646_v18, %v645_v21 }
 0x1e6   : > { %v647_v22 = vpack.c.bf16 %v644_v20, %v643_v19 }
 0x1e8   : > { %1152 = vmatprep.mubr.bf16.mxu1 %v647_v22 }
 0x1e9   : > { %1153 = vmatmul.mubr.bf16.vlgmr.msra.gmra.mxu1 %v648_v23 }
 0x2a9   : > { %v1154_v30 = vpop.f32.mrf.mxu1 }
 0x2aa   : > { %v763_v41 = vadd.f32 %v1154_v30, %v1062_v32 }
 0x2ab   : > { %v754_v31 = vpop.f32.mrf.mxu1 }
 0x2ac   : > { %v755_v34 = vadd.f32 %v1062_v32, %v754_v31  ;;  %v771_v43 = vmax.f32 %v763_v41, 0.0 }
 0x2ad   : > { %v1155_v33 = vpop.f32.mrf.mxu1 }
 0x2ae   : > { %v769_v37 = vmax.f32 %v755_v34, 0.0  ;;  %v766_v39 = vadd.f32 %v1155_v33, %v1062_v32 }
 0x2af   : > { %v757_v35 = vpop.f32.mrf.mxu1 }
 0x2b0   : > { %v758_v36 = vadd.f32 %v1062_v32, %v757_v35  ;;  %v772_v42 = vmax.f32 %v766_v39, 0.0 }
 0x2b2   : > { %v770_v38 = vmax.f32 %v758_v36, 0.0  ;;  %v774_v44 = vpack.c.bf16 %v772_v42, %v771_v43 }
 0x2b4   : > { %v773_v40 = vpack.c.bf16 %v770_v38, %v769_v37 }
 0x2b6   : > { %916 = vmatmul.mubr.bf16.vlgmr.msra.gmra.mxu0 %v773_v40 }
 0x2b7   : > { %925 = vmatprep.mubr.bf16.mxu0 %v1313_v1 }
 0x2be   : > { %926 = vmatmul.mubr.bf16.gmra.mxu0 %v774_v44 }
 0x376   : > { %v917_v52 = vpop.f32.mrf.mxu0 }
 0x377   : > { %v918_v53 = vadd.f32 %v917_v52, %v796_v50 }
 0x378   : > { %v919_v1 = vpop.f32.mrf.mxu0 }
 0x379   : > { %v936_v54 = vmax.f32 %v918_v53, 0.0  ;;  %v920_v55 = vadd.f32 %v919_v1, %v800_v51 }
 0x37a   : > { %v921_v56 = vpop.f32.mrf.mxu0 }
 0x37b   : > { %944 = vst [vmem:[%s328_s16] sm:$0xff] %v936_v54  ;;  %v937_v57 = vmax.f32 %v920_v55, 0.0  ;;  %v922_v58 = vadd.f32 %v921_v56, %v796_v50 }
 0x37c   : > { %v923_v59 = vpop.f32.mrf.mxu0 }
 0x37d   : > { %945 = vst.msk [vmem:[%s328_s16 + $0x8] sm:$0xff] %vm457_vm0, %v937_v57  ;;  %v938_v60 = vmax.f32 %v922_v58, 0.0  ;;  %v924_v61 = vadd.f32 %v923_v59, %v800_v51 }
 0x37e   : > { %v927_v62 = vpop.f32.mrf.mxu0 }
 0x37f   : > { %946 = vst [vmem:[%s328_s16 + $0x10] sm:$0xff] %v938_v60  ;;  %v939_v63 = vmax.f32 %v924_v61, 0.0  ;;  %v928_v0 = vadd.f32 %v927_v62, %v796_v50 }
 0x380   : > { %v929_v2 = vpop.f32.mrf.mxu0 }
 0x381   : > { %947 = vst.msk [vmem:[%s328_s16 + $0x18] sm:$0xff] %vm457_vm0, %v939_v63  ;;  %v940_v3 = vmax.f32 %v928_v0, 0.0  ;;  %v930_v4 = vadd.f32 %v929_v2, %v800_v51 }
 0x382   : > { %v931_v5 = vpop.f32.mrf.mxu0 }
 0x383   : > { %948 = vst [vmem:[%s328_s16 + $0x20] sm:$0xff] %v940_v3  ;;  %v941_v6 = vmax.f32 %v930_v4, 0.0  ;;  %v932_v7 = vadd.f32 %v931_v5, %v796_v50 }
 0x384   : > { %v933_v8 = vpop.f32.mrf.mxu0 }
 0x385   : > { %949 = vst.msk [vmem:[%s328_s16 + $0x28] sm:$0xff] %vm457_vm0, %v941_v6  ;;  %v942_v9 = vmax.f32 %v932_v7, 0.0  ;;  %v934_v10 = vadd.f32 %v933_v8, %v800_v51 }
 0x387   : > { %950 = vst [vmem:[%s328_s16 + $0x30] sm:$0xff] %v942_v9  ;;  %v943_v11 = vmax.f32 %v934_v10, 0.0 }
 0x389   : > { %951 = vst.msk [vmem:[%s328_s16 + $0x38] sm:$0xff] %vm457_vm0, %v943_v11 }
 0x38a   : > { %1264 = shalt.err (!%p1261_p3)
}
 0x38b   : > { %s1265_s14 = scalar_lea.hbm %s1603_s25, 1024  ;;  %s1269_s21 = scalar_lea.hbm %s1659_s9, 2048 }
 0x38c   : > { %p1266_p4 = scmp.ne.s32.totalorder %s1603_s25, %s1265_s14  ;;  %p1270_p9 = scmp.lt.s32.totalorder %s1603_s25, %s1659_s9 }
 0x38d   : > { %p1271_p10 = scmp.lt.s32.totalorder %s1269_s21, %s1265_s14 }
 0x38e   : > { %p1267_p7 = pnand %p1266_p4, %p1405_p5 }
 0x38f   : > { %p1272_p11 = por %p1271_p10, %p1270_p9 }
 0x390   : > { %p1268_p8 = pneg %p1267_p7 }
 0x392   : > { %p1273_p12 = pnand %p1272_p11, %p1268_p8 }
 0x394   : > { %1276 = shalt.err (!%p1273_p12)
}
 0x395   : > { %s1315_s26 = smov 256   ;;  %s1316_s27 = smov 16  }
 0x396   : > { %1156 = dma.vmem_to_hbm [thread:$0]  (%p1405_p5), %s1605_s22, 1024, %s1603_s25, %s1610_s13, %s1315_s26, %s1315_s26, %s1316_s27  }
 0x397 PF: > { %p1162_p13 = scmp.ge.s32.totalorder %s1311_s12, 2  ;;  %s982_s28 = sand.u32 1, %s1299_s30  }
 0x398   : > { %s983_s29 = scalar_lea.sflag [#allocation3], %s982_s28 }
 0x399   : > { %p1159_p0 = pnand %p1162_p13, %p1409_p6 }
 0x39b   : > { %p1160_p1 = pneg %p1159_p0 }
 0x39d   : > { %1294 = dma.done.wait (%p1160_p1), %s983_s29, 1024  }
 0x39e   : > { %1296 = vsyncadd (%p1160_p1), %s983_s29, 4294966272  ;;  %p19_p2 = scmp.ge.s32.totalorder %s1392_s15, 4   ;;  %s1662_s30 = smov %s1303_s10 }
 0x39f   : > { %s1663_s10 = smov %s1307_s11  ;;  %s1664_s11 = smov %s1403_s18 }
 0x3a0   : > { %s1665_s12 = smov %s1392_s15  ;;  %21 = sbr.rel (!%p19_p2) target bundleno = 3 (0x3), region = 91 }
 0x3a5   :  { %988 = vsyncpa [#allocation3], 1 }
 0x3a6   :  { %990 = vsyncpa [#allocation3 + $0x1], 1 }

</bundles_post_ra>
